<compile_context>
chip_gen: v7x
topology: tpu7x:2x2x1
jax: 0.10.0
libtpu: 0.0.40
codegen_flags: <defaults>
</compile_context>

<pallas_src>
import jax
import jax.numpy as jnp
from jax import lax
from jax.experimental import pallas as pl
from jax.experimental.pallas import tpu as pltpu

_LANES = 128


def _gather_copy_kernel(idx_ref, x_ref, o_ref):
    """x_ref/o_ref: (nb, C, P, Q) VMEM blocks; idx_ref: (C,) int32 in SMEM."""
    c_dim = o_ref.shape[1]

    def body(c, carry):
        src = idx_ref[c]
        # Dynamic slice on a major (non-tiled) axis: pure address arithmetic.
        o_ref[:, pl.ds(c, 1)] = x_ref[:, pl.ds(src, 1)]
        return carry

    # Fully unroll for the typical small channel counts (LLO visibility).
    lax.fori_loop(0, c_dim, body, 0, unroll=(c_dim <= 32))


def _vmem_capacity_bytes():
    try:
        info = pltpu.get_tpu_info()
        cap = getattr(info, "vmem_capacity_bytes", None)
        if cap:
            return int(cap)
    except Exception:
        pass
    return 64 * 1024 * 1024  # conservative default (v7x per-TensorCore)


def permute2d(x, indices):
    """Equivalent to PyTorch `input[:, indices, :, :]` for a 4-D NCHW tensor.

    x:       (N, C, H, W)
    indices: (C,) int32 permutation of [0, C)
    """
    assert x.ndim == 4
    N, C, H, W = x.shape
    indices = indices.astype(jnp.int32)
    itemsize = jnp.dtype(x.dtype).itemsize
    HW = H * W

    # Lane-dense reshape of each contiguous channel plane (metadata only).
    if HW % _LANES == 0:
        P, Q = HW // _LANES, _LANES
    else:
        P, Q = 1, HW
    xr = x.reshape(N, C, P, Q)

    # VMEM footprint of one batch row, including (sublane, lane) tile padding.
    row_pack = 8 * max(1, 4 // itemsize)  # 8 rows f32, 16 bf16, 32 int8
    padded_rows = -(-P // row_pack) * row_pack
    padded_cols = -(-Q // _LANES) * _LANES
    slab_vmem = C * padded_rows * padded_cols * itemsize  # per batch element

    vmem_cap = _vmem_capacity_bytes()
    headroom = 2 * 1024 * 1024
    # Leave margin for Mosaic internal scratch; conservative on v7x (64 MiB),
    # generous on v5e/v6e (128 MiB).
    target_vmem = min(vmem_cap * 3 // 4, vmem_cap - 12 * 1024 * 1024)
    # Default pipelining double-buffers both input and output: 4 live blocks.
    per_block_budget = max(slab_vmem, (target_vmem - headroom) // 4)

    nb = max(1, min(N, per_block_budget // slab_vmem))
    n_blocks = pl.cdiv(N, nb)
    # v7x megacore: avoid a degenerate single-step parallel grid when N >= 2.
    if n_blocks == 1 and N >= 2:
        nb = -(-N // 2)
        n_blocks = pl.cdiv(N, nb)

    block_vmem = nb * slab_vmem
    vmem_needed = 4 * block_vmem + headroom
    vmem_limit = int(
        min(max(vmem_needed, 32 * 1024 * 1024), vmem_cap - 8 * 1024 * 1024)
    )

    grid_spec = pltpu.PrefetchScalarGridSpec(
        num_scalar_prefetch=1,
        grid=(n_blocks,),
        in_specs=[
            # One contiguous slab of all channels for nb batch rows; the
            # gather happens in-kernel, so this is a plain tiled copy in/out.
            pl.BlockSpec((nb, C, P, Q), lambda b, idx: (b, 0, 0, 0)),
        ],
        out_specs=pl.BlockSpec((nb, C, P, Q), lambda b, idx: (b, 0, 0, 0)),
    )

    out = pl.pallas_call(
        _gather_copy_kernel,
        out_shape=jax.ShapeDtypeStruct(xr.shape, x.dtype),
        grid_spec=grid_spec,
        compiler_params=pltpu.CompilerParams(
            dimension_semantics=("parallel",),
            vmem_limit_bytes=vmem_limit,
        ),
        cost_estimate=pl.CostEstimate(
            flops=0,
            transcendentals=0,
            bytes_accessed=2 * N * C * HW * itemsize,
        ),
    )(indices, xr)

    return out.reshape(N, C, H, W)


class Permute2d:
    """JAX port of torcheeg Permute2d. Default indices = reversed channel
    order; shuffle=True applies a deterministic (fixed-seed) random
    permutation of that, mirroring the PyTorch module's randperm shuffle."""

    def __init__(self, num_channels, shuffle, seed=0):
        self.num_channels = num_channels
        indices = jnp.arange(num_channels - 1, -1, -1, dtype=jnp.int32)
        if shuffle:
            perm = jax.random.permutation(jax.random.PRNGKey(seed), num_channels)
            indices = indices[perm]
        self.indices = indices
        # indices_inverse[indices[i]] = i
        self.indices_inverse = (
            jnp.zeros(num_channels, dtype=jnp.int32)
            .at[indices]
            .set(jnp.arange(num_channels, dtype=jnp.int32))
        )

    def __call__(self, x, reverse=False):
        assert x.ndim == 4
        idx = self.indices_inverse if reverse else self.indices
        return permute2d(x, idx)


if __name__ == "__main__":
    key = jax.random.PRNGKey(0)
    N, C, H, W = 2, 4, 16, 16
    x = jax.random.normal(key, (N, C, H, W), dtype=jnp.float32)

    mod = Permute2d(num_channels=C, shuffle=True, seed=0)

    y = mod(x, reverse=False)
    y = jax.block_until_ready(y)
    y_ref = x[:, mod.indices, :, :]
    assert jnp.allclose(y, y_ref), "forward permutation mismatch"

    x_back = mod(y, reverse=True)
    x_back = jax.block_until_ready(x_back)
    assert jnp.allclose(x_back, x), "inverse permutation mismatch"

    # Also exercise a non-128-multiple plane (9x9 EEG grid) and odd batch.
    x2 = jax.random.normal(jax.random.PRNGKey(1), (3, C, 9, 9), dtype=jnp.float32)
    y2 = jax.block_until_ready(mod(x2))
    assert jnp.allclose(y2, x2[:, mod.indices, :, :]), "9x9 plane mismatch"

    print("KERNEL_OK")
</pallas_src>

<mosaic_0001>
module attributes {stable_mosaic.version = 11 : i64} {
  func.func @_gather_copy_kernel(%arg0: i32, %arg1: memref<4xi32, #tpu.memory_space<smem>>, %arg2: memref<1x4x2x128xf32, #tpu.memory_space<vmem>>, %arg3: memref<1x4x2x128xf32, #tpu.memory_space<vmem>>) attributes {dimension_semantics = [#tpu.dimension_semantics<parallel>], iteration_bounds = array<i64: 2>, scalar_prefetch = 1 : i64, scratch_operands = 0 : i64, tpu.core_type = #tpu.core_type<tc>, window_params = [{transform_indices = @transform_0, window_bounds = array<i64: 1, 4, 2, 128>}, {transform_indices = @transform_1, window_bounds = array<i64: 1, 4, 2, 128>}]} {
    %c0_i32 = arith.constant 0 : i32
    %0 = arith.index_cast %c0_i32 : i32 to index
    %1 = memref.load %arg1[%0] : memref<4xi32, #tpu.memory_space<smem>>
    %c0 = arith.constant 0 : index
    %2 = arith.index_cast %1 : i32 to index
    %c0_0 = arith.constant 0 : index
    %c0_1 = arith.constant 0 : index
    %3 = vector.load %arg2[%c0, %2, %c0_0, %c0_1] : memref<1x4x2x128xf32, #tpu.memory_space<vmem>>, vector<1x1x2x128xf32>
    %c0_2 = arith.constant 0 : index
    %4 = arith.index_cast %c0_i32 : i32 to index
    %c0_3 = arith.constant 0 : index
    %c0_4 = arith.constant 0 : index
    %5 = vector.load %arg3[%c0_2, %4, %c0_3, %c0_4] : memref<1x4x2x128xf32, #tpu.memory_space<vmem>>, vector<1x1x2x128xf32>
    tpu.vector_store %arg3[%c0_2, %4, %c0_3, %c0_4], %3 {strides = array<i32>} : memref<1x4x2x128xf32, #tpu.memory_space<vmem>>, vector<1x1x2x128xf32>,
    %c1_i32 = arith.constant 1 : i32
    %6 = arith.index_cast %c1_i32 : i32 to index
    %7 = memref.load %arg1[%6] : memref<4xi32, #tpu.memory_space<smem>>
    %c0_5 = arith.constant 0 : index
    %8 = arith.index_cast %7 : i32 to index
    %c0_6 = arith.constant 0 : index
    %c0_7 = arith.constant 0 : index
    %9 = vector.load %arg2[%c0_5, %8, %c0_6, %c0_7] : memref<1x4x2x128xf32, #tpu.memory_space<vmem>>, vector<1x1x2x128xf32>
    %c0_8 = arith.constant 0 : index
    %10 = arith.index_cast %c1_i32 : i32 to index
    %c0_9 = arith.constant 0 : index
    %c0_10 = arith.constant 0 : index
    %11 = vector.load %arg3[%c0_8, %10, %c0_9, %c0_10] : memref<1x4x2x128xf32, #tpu.memory_space<vmem>>, vector<1x1x2x128xf32>
    tpu.vector_store %arg3[%c0_8, %10, %c0_9, %c0_10], %9 {strides = array<i32>} : memref<1x4x2x128xf32, #tpu.memory_space<vmem>>, vector<1x1x2x128xf32>,
    %c2_i32 = arith.constant 2 : i32
    %12 = arith.index_cast %c2_i32 : i32 to index
    %13 = memref.load %arg1[%12] : memref<4xi32, #tpu.memory_space<smem>>
    %c0_11 = arith.constant 0 : index
    %14 = arith.index_cast %13 : i32 to index
    %c0_12 = arith.constant 0 : index
    %c0_13 = arith.constant 0 : index
    %15 = vector.load %arg2[%c0_11, %14, %c0_12, %c0_13] : memref<1x4x2x128xf32, #tpu.memory_space<vmem>>, vector<1x1x2x128xf32>
    %c0_14 = arith.constant 0 : index
    %16 = arith.index_cast %c2_i32 : i32 to index
    %c0_15 = arith.constant 0 : index
    %c0_16 = arith.constant 0 : index
    %17 = vector.load %arg3[%c0_14, %16, %c0_15, %c0_16] : memref<1x4x2x128xf32, #tpu.memory_space<vmem>>, vector<1x1x2x128xf32>
    tpu.vector_store %arg3[%c0_14, %16, %c0_15, %c0_16], %15 {strides = array<i32>} : memref<1x4x2x128xf32, #tpu.memory_space<vmem>>, vector<1x1x2x128xf32>,
    %c3_i32 = arith.constant 3 : i32
    %18 = arith.index_cast %c3_i32 : i32 to index
    %19 = memref.load %arg1[%18] : memref<4xi32, #tpu.memory_space<smem>>
    %c0_17 = arith.constant 0 : index
    %20 = arith.index_cast %19 : i32 to index
    %c0_18 = arith.constant 0 : index
    %c0_19 = arith.constant 0 : index
    %21 = vector.load %arg2[%c0_17, %20, %c0_18, %c0_19] : memref<1x4x2x128xf32, #tpu.memory_space<vmem>>, vector<1x1x2x128xf32>
    %c0_20 = arith.constant 0 : index
    %22 = arith.index_cast %c3_i32 : i32 to index
    %c0_21 = arith.constant 0 : index
    %c0_22 = arith.constant 0 : index
    %23 = vector.load %arg3[%c0_20, %22, %c0_21, %c0_22] : memref<1x4x2x128xf32, #tpu.memory_space<vmem>>, vector<1x1x2x128xf32>
    tpu.vector_store %arg3[%c0_20, %22, %c0_21, %c0_22], %21 {strides = array<i32>} : memref<1x4x2x128xf32, #tpu.memory_space<vmem>>, vector<1x1x2x128xf32>,
    %c4_i32 = arith.constant 4 : i32
    return
  }
  func.func @transform_0(%arg0: i32, %arg1: memref<4xi32, #tpu.memory_space<smem>>) -> (i32, i32, i32, i32) {
    %c0_i32 = arith.constant 0 : i32
    %c0_i32_0 = arith.constant 0 : i32
    %c0_i32_1 = arith.constant 0 : i32
    %c0_i32_2 = arith.constant 0 : i32
    return %arg0, %c0_i32, %c0_i32_0, %c0_i32_1 : i32, i32, i32, i32
  }
  func.func @transform_1(%arg0: i32, %arg1: memref<4xi32, #tpu.memory_space<smem>>) -> (i32, i32, i32, i32) {
    %c0_i32 = arith.constant 0 : i32
    %c0_i32_0 = arith.constant 0 : i32
    %c0_i32_1 = arith.constant 0 : i32
    %c0_i32_2 = arith.constant 0 : i32
    return %arg0, %c0_i32, %c0_i32_0, %c0_i32_1 : i32, i32, i32, i32
  }
}

</mosaic_0001>

<bundles_post_ra>
// kernel: tpu_custom_call.1
= control target key start
LH: loop header
LB: loop body
LE: loop exit
PB: predicated region body
PF: predicated region fallthrough
CT: control target
= control target key end

     0   :  { %s641_s0 = inlined_call_operand.hbm [shape: s32[4], index: 0, kind: input, shape index: {}]   ;;  %s642_s1 = inlined_call_operand.hbm [shape: f32[2,4,2,128], index: 1, kind: input, shape index: {}]   ;;  %s643_s2 = inlined_call_operand.hbm [shape: f32[2,4,2,128], index: 2, kind: output, shape index: {}]  }
   0x1   :  { %s335_s11 = scalar_lea.hbm %s641_s0, 16 }
   0x2   :  { %p336_p0 = scmp.ne.s32.totalorder %s641_s0, %s335_s11  ;;  %p339_p1 = scmp.lt.u32.totalorder %s335_s11, %s641_s0 }
   0x4   :  { %p341_p2 = pnand %p339_p1, %p336_p0 }
   0x6   :  { %344 = shalt.err (!%p341_p2)  }
   0x7   :  { %s445_s16 = smov [#allocation3]  }
   0x8   :  { %8 = dma.hbm_to_smem %s641_s0, 16, %s445_s16, [#allocation2] }
   0x9   :  { %419 = dma.done.wait [#allocation2], 16 }
   0xa   :  { %420 = vsyncadd [#allocation2], 4294967280 }
   0xb   :  { %10 = sfence }
   0xc   :  { %11 = vsyncpa [#allocation5], 0 }
   0xd   :  { %13 = vsyncpa [#allocation5 + $0x1], 0 }
   0xe   :  { %14 = vsyncpa [#allocation6], 0 }
   0xf   :  { %16 = vsyncpa [#allocation6 + $0x1], 0  ;;  %s479_s19 = smov 0   ;;  %s481_s20 = smov 0  }
  0x10   :  { %s483_s21 = smov 0   ;;  %s485_s22 = smov 0  }
  0x11 LB: > { %s500_s0 = sadd.s32 4294967295, %s443_s22   ;;  %s258_s23 = sadd.s32 4294967294, %s443_s22   ;;  %s443_s22 = sphi %s485_s22, %s656_s22   ;;  %s439_s21 = sphi %s483_s21, %s655_s21   ;;  %s435_s20 = sphi %s481_s20, %s654_s20   ;;  %s431_s19 = sphi %s479_s19, %s653_s19  }
  0x12   : > { %s504_s24 = sadd.s32 1, %s443_s22   ;;  %s29_s25 = sadd.s32 1, %s439_s21 }
  0x13   : > { %s26_s26 = ssub.s32 %s443_s22, %s504_s24  ;;  %p36_p3 = scmp.ne.s32.totalorder %s439_s21, %s435_s20 }
  0x14   : > { %p27_p4 = scmp.eq.s32.totalorder %s26_s26, 0  ;;  %p37_p5 = scmp.eq.s32.totalorder %s443_s22, 0 }
  0x15   : > { %p42_p6 = scmp.ne.s32.totalorder %s435_s20, %s431_s19  ;;  %p43_p7 = scmp.eq.s32.totalorder %s500_s0, 0 }
  0x16   : > { %s516_s27 = scalar_select %p27_p4, %s439_s21, %s29_s25  }
  0x17   : > { %p518_p8 = por %p37_p5, %p36_p3  ;;  %p522_p9 = por %p43_p7, %p42_p6 }
  0x18   : > { %p66_p10 = scmp.eq.s32.totalorder %s500_s0, 1  ;;  %p72_p11 = scmp.eq.s32.totalorder %s258_s23, 1 }
  0x19   : > { %p296_p13 = scmp.lt.s32.totalorder %s443_s22, 2  ;;  %s92_s4 = sand.u32 1, %s439_s21  }
  0x1a   : > { %p529_p0 = por %p66_p10, %p36_p3  ;;  %p533_p1 = por %p72_p11, %p42_p6 }
  0x1b   : > { %s282_s5 = sshll.u32 %s443_s22, 7  ;;  %s261_s6 = sshll.u32 %s92_s4, 3 }
  0x1c   : > { %s647_s30 = scalar_select %p529_p0, 1, 0 }
  0x1d   : > { %s648_s3 = scalar_select %p533_p1, 1, 0 }
  0x1e   : > { %s542_s9 = scalar_lea.hbm %s642_s1, %s282_s5  ;;  %s96_s10 = scalar_lea.vmem [#allocation4], %s261_s6 }
  0x1f   : > { %s103_s11 = sshll.u32 %s96_s10, 4  ;;  %p546_p2 = pnand %p296_p13, %p518_p8  ;;  %s550_s11 = int_to_ptr.vmem [resolvable:$true] %s103_s11 }
  0x20   : > { %s552_s13 = scalar_lea.sflag [#allocation5], %s92_s4  ;;  %s345_s14 = scalar_lea.hbm %s542_s9, 128 }
  0x21   : > { %p346_p3 = scmp.ne.s32.totalorder %s542_s9, %s345_s14  ;;  %p347_p4 = pneg %p546_p2 }
  0x22   : > { %s350_s17 = scalar_lea.hbm %s642_s1, 256  ;;  %p351_p7 = scmp.lt.u32.totalorder %s542_s9, %s642_s1 }
  0x23   : > { %p348_p5 = pnand %p347_p4, %p346_p3  ;;  %p352_p8 = scmp.lt.u32.totalorder %s350_s17, %s345_s14 }
  0x24   : > { %p354_p11 = scmp.lt.u32.totalorder %s345_s14, %s542_s9 }
  0x25   : > { %p349_p6 = pneg %p348_p5  ;;  %p353_p10 = por %p352_p8, %p351_p7 }
  0x27   : > { %p355_p13 = por %p354_p11, %p353_p10 }
  0x29   : > { %p356_p12 = pnand %p355_p13, %p349_p6 }
  0x2b   : > { %359 = shalt.err (!%p356_p12)
}
  0x2c   : > { %s360_s25 = scalar_lea.vmem %s550_s11, 128  ;;  %s446_s26 = smov [#allocation4]  }
  0x2d   : > { %p361_p3 = scmp.ne.s32.totalorder %s550_s11, %s360_s25  ;;  %s365_s28 = sshll.u32 %s446_s26, 4  ;;  %s366_s28 = int_to_ptr.vmem [resolvable:$false] %s365_s28 }
  0x2e   : > { %s367_s4 = scalar_lea.vmem %s366_s28, 256  ;;  %p368_p0 = scmp.lt.s32.totalorder %s550_s11, %s366_s28 }
  0x2f   : > { %p363_p5 = pnand %p361_p3, %p347_p4  ;;  %p369_p7 = scmp.lt.s32.totalorder %s367_s4, %s360_s25 }
  0x31   : > { %p364_p1 = pneg %p363_p5  ;;  %p370_p8 = por %p369_p7, %p368_p0 }
  0x33   : > { %p371_p10 = pnand %p370_p8, %p364_p1 }
  0x35   : > { %374 = shalt.err (!%p371_p10)
}
  0x36   : > { %s447_s5 = smov 32   ;;  %s448_s6 = smov 2  }
  0x37   : > { %291 = dma.hbm_to_vmem [thread:$0]  (!%p546_p2), %s542_s9, 128, %s550_s11, %s552_s13, %s447_s5, %s447_s5, %s448_s6  }
  0x38   : > { %p264_p12 = scmp.ge.s32.totalorder %s443_s22, 1  ;;  %p111_p4 = scmp.lt.s32.totalorder %s443_s22, 3 }
  0x3a   : > { %p112_p6 = pnand %p264_p12, %p111_p4 }
  0x3b   : > { %s583_s7 = sand.u32 (!%p112_p6), 1, %s435_s20  }
  0x3c   : > { %115 = sbr.rel (%p112_p6) target bundleno = 102 (0x66), region = 24  ;;  %s265_s8 = sshll.u32 (!%p112_p6), %s583_s7, 3 }
  0x3d   : > { %s118_s10 = scalar_lea.sflag (!%p112_p6), [#allocation5], %s583_s7  ;;  %s121_s14 = scalar_lea.vmem (!%p112_p6), [#allocation4], %s265_s8 }
  0x43   : > { %422 = dma.done.wait (%p522_p9), %s118_s10, 128  }
  0x44   : > { %424 = vsyncadd (%p522_p9), %s118_s10, 4294967168  ;;  %s140_s9 = sld [smem:[#allocation3]]  ;;  %s139_s11 = scalar_lea.vmem [#allocation7], %s265_s8 }
  0x45   : > { %s177_s12 = sshll.u32 %s139_s11, 4  ;;  %s268_s13 = sld [smem:[#allocation3 + $0x1]]  ;;  %s592_s12 = int_to_ptr.vmem [resolvable:$true] %s177_s12 }
  0x46   : > { %s271_s15 = sld [smem:[#allocation3 + $0x2]]  ;;  %s274_s16 = sld [smem:[#allocation3 + $0x3]] }
  0x47   : > { %s283_s17 = sshll.u32 %s500_s0, 7  ;;  %s164_s10 = scalar_lea.sflag [#allocation6], %s583_s7 }
  0x48   : > { %s597_s26 = scalar_lea.hbm %s643_s2, %s283_s17  ;;  %p650_p0 = scmp.ne.s32.totalorder %s647_s30, 0 }
  0x4a   : > { %s267_s18 = sshll.u32 %s140_s9, 1  ;;  %s375_s9 = scalar_lea.vmem %s592_s12, 128 }
  0x4b   : > { %s142_s28 = scalar_lea.vmem %s121_s14, %s267_s18 [#allocation4]  ;;  %s269_s29 = sshll.u32 %s268_s13, 1 }
  0x4c   : > { %v143_v0 = vld [vmem:[%s142_s28] sm:$0x3]  ;;  %s147_s4 = scalar_lea.vmem %s121_s14, %s269_s29 [#allocation4]  ;;  %s272_s5 = sshll.u32 %s271_s15, 1 }
  0x4d   : > { %144 = vst [vmem:[%s139_s11] sm:$0x3] %v143_v0  ;;  %v148_v1 = vld [vmem:[%s147_s4] sm:$0x3]  ;;  %s153_s0 = scalar_lea.vmem %s121_s14, %s272_s5 [#allocation4]  ;;  %s275_s6 = sshll.u32 %s274_s16, 1 }
  0x4e   : > { %270 = vst [vmem:[%s139_s11 + $0x2] sm:$0x3] %v148_v1  ;;  %v154_v2 = vld [vmem:[%s153_s0] sm:$0x3]  ;;  %s159_s8 = scalar_lea.vmem %s121_s14, %s275_s6 [#allocation4]  ;;  %p376_p9 = scmp.ne.s32.totalorder %s592_s12, %s375_s9 }
  0x4f   : > { %273 = vst [vmem:[%s139_s11 + $0x4] sm:$0x3] %v154_v2  ;;  %v160_v3 = vld [vmem:[%s159_s8] sm:$0x3]  ;;  %s449_s13 = smov [#allocation7]  }
  0x50   : > { %276 = vst [vmem:[%s139_s11 + $0x6] sm:$0x3] %v160_v3  ;;  %p377_p1 = pnand %p376_p9, %p650_p0  ;;  %s379_s17 = sshll.u32 %s449_s13, 4  ;;  %s380_s17 = int_to_ptr.vmem [resolvable:$false] %s379_s17 }
  0x51   : > { %s381_s15 = scalar_lea.vmem %s380_s17, 256  ;;  %p382_p11 = scmp.lt.s32.totalorder %s592_s12, %s380_s17 }
  0x52   : > { %p378_p2 = pneg %p377_p1  ;;  %p383_p13 = scmp.lt.s32.totalorder %s381_s15, %s375_s9 }
  0x54   : > { %p384_p3 = por %p383_p13, %p382_p11 }
  0x56   : > { %p385_p5 = pnand %p384_p3, %p378_p2 }
  0x58   : > { %388 = shalt.err (!%p385_p5)
}
  0x59   : > { %s389_s14 = scalar_lea.hbm %s597_s26, 128  ;;  %s393_s18 = scalar_lea.hbm %s643_s2, 256 }
  0x5a   : > { %p390_p7 = scmp.ne.s32.totalorder %s597_s26, %s389_s14  ;;  %p394_p12 = scmp.lt.u32.totalorder %s597_s26, %s643_s2 }
  0x5b   : > { %p395_p4 = scmp.lt.u32.totalorder %s393_s18, %s389_s14  ;;  %p397_p9 = scmp.lt.u32.totalorder %s389_s14, %s597_s26 }
  0x5c   : > { %p391_p8 = pnand %p390_p7, %p650_p0 }
  0x5d   : > { %p396_p6 = por %p395_p4, %p394_p12 }
  0x5e   : > { %p392_p10 = pneg %p391_p8 }
  0x5f   : > { %p398_p1 = por %p397_p9, %p396_p6 }
  0x61   : > { %p399_p2 = pnand %p398_p1, %p392_p10 }
  0x63   : > { %402 = shalt.err (!%p399_p2)
}
  0x64   : > { %s450_s28 = smov 32   ;;  %s451_s29 = smov 2  }
  0x65   : > { %286 = dma.vmem_to_hbm [thread:$0]  (%p650_p0), %s592_s12, 128, %s597_s26, %s164_s10, %s450_s28, %s450_s28, %s451_s29  }
  0x66 PF: > { %s192_s4 = sand.u32 1, %s431_s19   ;;  %p651_p11 = scmp.ne.s32.totalorder %s648_s3, 0 }
  0x67   : > { %p652_p13 = scmp.ge.s32.totalorder %s443_s22, 2  ;;  %s193_s5 = scalar_lea.sflag [#allocation6], %s192_s4 }
  0x69   : > { %p293_p3 = pnand %p652_p13, %p651_p11 }
  0x6b   : > { %426 = dma.done.wait (!%p293_p3), %s193_s5, 128  }
  0x6c   : > { %428 = vsyncadd (!%p293_p3), %s193_s5, 4294967168  ;;  %p19_p5 = scmp.ge.s32.totalorder %s504_s24, 4   ;;  %s653_s19 = smov %s435_s20 }
  0x6d   : > { %s654_s20 = smov %s439_s21  ;;  %s655_s21 = smov %s516_s27 }
  0x6e   : > { %s656_s22 = smov %s504_s24  ;;  %21 = sbr.rel (!%p19_p5) target bundleno = 17 (0x11), region = 76 }
  0x75   :  { %198 = vsyncpa [#allocation5], 1 }
  0x76   :  { %200 = vsyncpa [#allocation5 + $0x1], 1 }
  0x77   :  { %201 = vsyncpa [#allocation6], 1 }
  0x78   :  { %203 = vsyncpa [#allocation6 + $0x1], 1 }

</bundles_post_ra>
